<compile_context>
chip_gen: v6e
topology: v6e:2x2x1
jax: 0.10.0
libtpu: 0.0.40
codegen_flags: <defaults>
</compile_context>

<pallas_src>
import jax
import jax.numpy as jnp
from jax.experimental import pallas as pl
from jax.experimental.pallas import tpu as pltpu


def _round_up(x, m):
    return (x + m - 1) // m * m


def _choose_bn(B, target):
    """Lane-dense batch tile: multiple of 128, as large as `target`, but capped
    at ~half the padded batch so the grid has >= 2 steps when possible (v7x
    megacore sharding of the 'parallel' batch axis)."""
    b128 = _round_up(max(B, 1), 128)
    half = _round_up((b128 + 1) // 2, 128)
    return max(128, min(target, half))


def fish_classify_kernel(x_ref, w1_ref, b1_ref, w2_ref, b2_ref, w3_ref, b3_ref,
                         o_ref):
    """Batch-in-lane layout: x block (3, bn) -> output block (9, bn)."""
    x = x_ref[...]                                       # (3, bn) f32

    # ---- layer 1: (12,3) @ (3,bn).  K=3 -> skip the MXU, 3 VPU broadcast FMAs.
    w1 = w1_ref[...]                                     # (12, 3)
    h1 = (w1[:, 0:1] * x[0:1, :]
          + w1[:, 1:2] * x[1:2, :]
          + w1[:, 2:3] * x[2:3, :]
          + b1_ref[...])                                 # (12, bn)
    h1 = jnp.maximum(h1, 0.0)

    # ---- layer 2: (24,12) @ (12,bn) on the MXU (N = bn, lane-dense)
    h2 = jnp.dot(w2_ref[...], h1,
                 preferred_element_type=jnp.float32) + b2_ref[...]
    h2 = jnp.maximum(h2, 0.0)

    # ---- layer 3 + numerically-stable softmax over the 9 classes (sublane axis)
    logits = jnp.dot(w3_ref[...], h2,
                     preferred_element_type=jnp.float32) + b3_ref[...]  # (9, bn)
    m = jnp.max(logits, axis=0, keepdims=True)
    e = jnp.exp(logits - m)
    denom = jnp.sum(e, axis=0, keepdims=True)            # >= 1 (max-subtraction)
    inv = pl.reciprocal(denom, approx=True)               # EUP slot
    inv = inv * (2.0 - denom * inv)                       # one Newton step -> ~f32
    o_ref[...] = (e * inv).astype(o_ref.dtype)


def fish_classify_probs_t(xt, params, *, bn_target=16384, out_dtype=jnp.float32):
    """Feature-major entry point (no wrapper transposes).
    xt: (3, B) float32.  Returns (9, B_pad) probabilities; columns >= B are the
    softmax of padded zeros and must be sliced off by the caller."""
    _, B = xt.shape
    bn = _choose_bn(B, bn_target)
    B_pad = _round_up(B, bn)
    if B_pad != B:
        xt = jnp.pad(xt, ((0, 0), (0, B_pad - B)))

    w1, b1 = params["w1"], params["b1"]
    w2, b2 = params["w2"], params["b2"]
    w3, b3 = params["w3"], params["b3"]

    full = lambda a: pl.BlockSpec(a.shape, lambda i: (0, 0))

    return pl.pallas_call(
        fish_classify_kernel,
        out_shape=jax.ShapeDtypeStruct((9, B_pad), out_dtype),
        grid_spec=pl.GridSpec(
            grid=(B_pad // bn,),
            in_specs=[
                pl.BlockSpec((3, bn), lambda i: (0, i)),   # lane-dense x tile
                full(w1), full(b1),
                full(w2), full(b2),
                full(w3), full(b3),
            ],
            out_specs=pl.BlockSpec((9, bn), lambda i: (0, i)),  # lane-dense store
        ),
        compiler_params=pltpu.CompilerParams(
            dimension_semantics=("parallel",),        # shard batch tiles on v7x
            vmem_limit_bytes=48 * 1024 * 1024,        # big tiles fit on v5e..v7x
        ),
    )(xt, w1, b1, w2, b2, w3, b3)


def fish_classify_forward(x, params, *, bn_target=16384, out_dtype=jnp.float32):
    """PyTorch-style entry: x (B, 3) -> (B, 9) softmax probabilities.
    NOTE: the transpose-in / transpose-out here are separate HBM passes; keep a
    (features, batch) layout in the surrounding graph and call
    fish_classify_probs_t directly to avoid them."""
    B = x.shape[0]
    xt = x.astype(jnp.float32).T                          # (3, B)
    out_t = fish_classify_probs_t(xt, params, bn_target=bn_target,
                                  out_dtype=out_dtype)    # (9, B_pad)
    return out_t[:, :B].T                                 # back to (B, 9)


def init_params(key):
    """Deterministic init matching nn.Linear (PyTorch (out, in) layout)."""
    def linear(key, fan_in, fan_out):
        kw, kb = jax.random.split(key)
        bound = 1.0 / jnp.sqrt(fan_in)
        w = jax.random.uniform(kw, (fan_out, fan_in), jnp.float32, -bound, bound)
        b = jax.random.uniform(kb, (fan_out, 1), jnp.float32, -bound, bound)
        return w, b

    k1, k2, k3 = jax.random.split(key, 3)
    w1, b1 = linear(k1, 3, 12)
    w2, b2 = linear(k2, 12, 24)
    w3, b3 = linear(k3, 24, 9)
    return {"w1": w1, "b1": b1, "w2": w2, "b2": b2, "w3": w3, "b3": b3}


def reference_forward(x, p):
    hp = jax.lax.Precision.HIGHEST
    h1 = jnp.maximum(jnp.dot(x, p["w1"].T, precision=hp) + p["b1"].T, 0.0)
    h2 = jnp.maximum(jnp.dot(h1, p["w2"].T, precision=hp) + p["b2"].T, 0.0)
    logits = jnp.dot(h2, p["w3"].T, precision=hp) + p["b3"].T
    return jax.nn.softmax(logits, axis=-1)


if __name__ == "__main__":
    key = jax.random.PRNGKey(0)
    kx, kp = jax.random.split(key)
    params = init_params(kp)

    # Small shape consistent with the module: batch = 8, 3 input features.
    B = 8
    x = jax.random.normal(kx, (B, 3), jnp.float32)
    out = jax.block_until_ready(fish_classify_forward(x, params))
    ref = reference_forward(x, params)
    assert out.shape == (B, 9)
    # tolerance covers MXU f32 precision-mode differences across generations
    # plus the EUP approx-reciprocal + Newton divide (typical agreement ~1e-5)
    assert jnp.allclose(out, ref, atol=5e-3, rtol=5e-3), "mismatch vs reference"
    assert jnp.allclose(jnp.sum(out, axis=-1), 1.0, atol=1e-3), \
        "softmax rows must sum to 1"

    # Second batch exercises a multi-step grid (>= 2 tiles -> megacore-shardable
    # 'parallel' axis) and the padded-column path.
    B2 = 300
    x2 = jax.random.normal(jax.random.PRNGKey(1), (B2, 3), jnp.float32)
    out2 = jax.block_until_ready(fish_classify_forward(x2, params))
    ref2 = reference_forward(x2, params)
    assert out2.shape == (B2, 9)
    assert jnp.allclose(out2, ref2, atol=5e-3, rtol=5e-3), "mismatch (multi-tile)"

    print("KERNEL_OK")
</pallas_src>

<mosaic_0001>
module attributes {stable_mosaic.version = 11 : i64} {
  func.func @fish_classify_kernel(%arg0: i32, %arg1: memref<3x128xf32, #tpu.memory_space<vmem>>, %arg2: memref<12x3xf32, #tpu.memory_space<vmem>>, %arg3: memref<12x1xf32, #tpu.memory_space<vmem>>, %arg4: memref<24x12xf32, #tpu.memory_space<vmem>>, %arg5: memref<24x1xf32, #tpu.memory_space<vmem>>, %arg6: memref<9x24xf32, #tpu.memory_space<vmem>>, %arg7: memref<9x1xf32, #tpu.memory_space<vmem>>, %arg8: memref<9x128xf32, #tpu.memory_space<vmem>>) attributes {dimension_semantics = [#tpu.dimension_semantics<parallel>], iteration_bounds = array<i64: 1>, scalar_prefetch = 0 : i64, scratch_operands = 0 : i64, tpu.core_type = #tpu.core_type<tc>, window_params = [{transform_indices = @transform_0, window_bounds = array<i64: 3, 128>}, {pipeline_mode = #tpu.pipeline_mode<synchronous>, transform_indices = @transform_1, window_bounds = array<i64: 12, 3>}, {pipeline_mode = #tpu.pipeline_mode<synchronous>, transform_indices = @transform_2, window_bounds = array<i64: 12, 1>}, {pipeline_mode = #tpu.pipeline_mode<synchronous>, transform_indices = @transform_3, window_bounds = array<i64: 24, 12>}, {pipeline_mode = #tpu.pipeline_mode<synchronous>, transform_indices = @transform_4, window_bounds = array<i64: 24, 1>}, {pipeline_mode = #tpu.pipeline_mode<synchronous>, transform_indices = @transform_5, window_bounds = array<i64: 9, 24>}, {pipeline_mode = #tpu.pipeline_mode<synchronous>, transform_indices = @transform_6, window_bounds = array<i64: 9, 1>}, {transform_indices = @transform_7, window_bounds = array<i64: 9, 128>}]} {
    %c0 = arith.constant 0 : index
    %c0_0 = arith.constant 0 : index
    %0 = vector.load %arg1[%c0, %c0_0] : memref<3x128xf32, #tpu.memory_space<vmem>>, vector<3x128xf32>
    %c0_1 = arith.constant 0 : index
    %c0_2 = arith.constant 0 : index
    %1 = vector.load %arg2[%c0_1, %c0_2] : memref<12x3xf32, #tpu.memory_space<vmem>>, vector<12x3xf32>
    %2 = vector.extract_strided_slice %1 {offsets = [0, 0], sizes = [12, 1], strides = [1, 1]} : vector<12x3xf32> to vector<12x1xf32>
    %3 = vector.extract_strided_slice %0 {offsets = [0, 0], sizes = [1, 128], strides = [1, 1]} : vector<3x128xf32> to vector<1x128xf32>
    %4 = vector.broadcast %2 : vector<12x1xf32> to vector<12x128xf32>
    %5 = vector.broadcast %3 : vector<1x128xf32> to vector<12x128xf32>
    %6 = arith.mulf %4, %5 : vector<12x128xf32>
    %7 = vector.extract_strided_slice %1 {offsets = [0, 1], sizes = [12, 1], strides = [1, 1]} : vector<12x3xf32> to vector<12x1xf32>
    %8 = vector.extract_strided_slice %0 {offsets = [1, 0], sizes = [1, 128], strides = [1, 1]} : vector<3x128xf32> to vector<1x128xf32>
    %9 = vector.broadcast %7 : vector<12x1xf32> to vector<12x128xf32>
    %10 = vector.broadcast %8 : vector<1x128xf32> to vector<12x128xf32>
    %11 = arith.mulf %9, %10 : vector<12x128xf32>
    %12 = arith.addf %6, %11 : vector<12x128xf32>
    %13 = vector.extract_strided_slice %1 {offsets = [0, 2], sizes = [12, 1], strides = [1, 1]} : vector<12x3xf32> to vector<12x1xf32>
    %14 = vector.extract_strided_slice %0 {offsets = [2, 0], sizes = [1, 128], strides = [1, 1]} : vector<3x128xf32> to vector<1x128xf32>
    %15 = vector.broadcast %13 : vector<12x1xf32> to vector<12x128xf32>
    %16 = vector.broadcast %14 : vector<1x128xf32> to vector<12x128xf32>
    %17 = arith.mulf %15, %16 : vector<12x128xf32>
    %18 = arith.addf %12, %17 : vector<12x128xf32>
    %c0_3 = arith.constant 0 : index
    %c0_4 = arith.constant 0 : index
    %19 = vector.load %arg3[%c0_3, %c0_4] : memref<12x1xf32, #tpu.memory_space<vmem>>, vector<12x1xf32>
    %20 = vector.broadcast %19 : vector<12x1xf32> to vector<12x128xf32>
    %21 = arith.addf %18, %20 : vector<12x128xf32>
    %cst = arith.constant 0.000000e+00 : f32
    %22 = vector.broadcast %cst : f32 to vector<12x128xf32>
    %23 = arith.maximumf %21, %22 : vector<12x128xf32>
    %c0_5 = arith.constant 0 : index
    %c0_6 = arith.constant 0 : index
    %24 = vector.load %arg4[%c0_5, %c0_6] : memref<24x12xf32, #tpu.memory_space<vmem>>, vector<24x12xf32>
    %cst_7 = arith.constant dense<0.000000e+00> : vector<24x128xf32>
    %25 = tpu.matmul %24, %23, %cst_7 {dimension_numbers = #tpu.dot_dimension_numbers<[1], [0], [0], [1], [0, 0, 1, 1], [], []>} : vector<24x12xf32>, vector<12x128xf32>, vector<24x128xf32> -> vector<24x128xf32>
    %c0_8 = arith.constant 0 : index
    %c0_9 = arith.constant 0 : index
    %26 = vector.load %arg5[%c0_8, %c0_9] : memref<24x1xf32, #tpu.memory_space<vmem>>, vector<24x1xf32>
    %27 = vector.broadcast %26 : vector<24x1xf32> to vector<24x128xf32>
    %28 = arith.addf %25, %27 : vector<24x128xf32>
    %cst_10 = arith.constant 0.000000e+00 : f32
    %29 = vector.broadcast %cst_10 : f32 to vector<24x128xf32>
    %30 = arith.maximumf %28, %29 : vector<24x128xf32>
    %c0_11 = arith.constant 0 : index
    %c0_12 = arith.constant 0 : index
    %31 = vector.load %arg6[%c0_11, %c0_12] : memref<9x24xf32, #tpu.memory_space<vmem>>, vector<9x24xf32>
    %cst_13 = arith.constant dense<0.000000e+00> : vector<9x128xf32>
    %32 = tpu.matmul %31, %30, %cst_13 {dimension_numbers = #tpu.dot_dimension_numbers<[1], [0], [0], [1], [0, 0, 1, 1], [], []>} : vector<9x24xf32>, vector<24x128xf32>, vector<9x128xf32> -> vector<9x128xf32>
    %c0_14 = arith.constant 0 : index
    %c0_15 = arith.constant 0 : index
    %33 = vector.load %arg7[%c0_14, %c0_15] : memref<9x1xf32, #tpu.memory_space<vmem>>, vector<9x1xf32>
    %34 = vector.broadcast %33 : vector<9x1xf32> to vector<9x128xf32>
    %35 = arith.addf %32, %34 : vector<9x128xf32>
    %cst_16 = arith.constant dense<0xFF800000> : vector<128xf32>
    %36 = vector.multi_reduction <maximumf>, %35, %cst_16 [0] : vector<9x128xf32> to vector<128xf32>
    %37 = vector.shape_cast %36 : vector<128xf32> to vector<1x128xf32>
    %38 = vector.broadcast %37 : vector<1x128xf32> to vector<9x128xf32>
    %39 = arith.subf %35, %38 : vector<9x128xf32>
    %40 = math.exp %39 : vector<9x128xf32>
    %cst_17 = arith.constant dense<0.000000e+00> : vector<128xf32>
    %41 = vector.multi_reduction <add>, %40, %cst_17 [0] : vector<9x128xf32> to vector<128xf32>
    %42 = vector.shape_cast %41 : vector<128xf32> to vector<1x128xf32>
    %43 = tpu.reciprocal %42 {approx = true} : vector<1x128xf32> -> vector<1x128xf32>
    %44 = arith.mulf %42, %43 : vector<1x128xf32>
    %cst_18 = arith.constant 2.000000e+00 : f32
    %45 = vector.broadcast %cst_18 : f32 to vector<1x128xf32>
    %46 = arith.subf %45, %44 : vector<1x128xf32>
    %47 = arith.mulf %43, %46 : vector<1x128xf32>
    %48 = vector.broadcast %47 : vector<1x128xf32> to vector<9x128xf32>
    %49 = arith.mulf %40, %48 : vector<9x128xf32>
    %c0_19 = arith.constant 0 : index
    %c0_20 = arith.constant 0 : index
    %50 = vector.load %arg8[%c0_19, %c0_20] : memref<9x128xf32, #tpu.memory_space<vmem>>, vector<9x128xf32>
    tpu.vector_store %arg8[%c0_19, %c0_20], %49 {strides = array<i32>} : memref<9x128xf32, #tpu.memory_space<vmem>>, vector<9x128xf32>,
    return
  }
  func.func @transform_0(%arg0: i32) -> (i32, i32) {
    %c0_i32 = arith.constant 0 : i32
    %c0_i32_0 = arith.constant 0 : i32
    return %c0_i32, %arg0 : i32, i32
  }
  func.func @transform_1(%arg0: i32) -> (i32, i32) {
    %c0_i32 = arith.constant 0 : i32
    %c0_i32_0 = arith.constant 0 : i32
    %c0_i32_1 = arith.constant 0 : i32
    return %c0_i32, %c0_i32_0 : i32, i32
  }
  func.func @transform_2(%arg0: i32) -> (i32, i32) {
    %c0_i32 = arith.constant 0 : i32
    %c0_i32_0 = arith.constant 0 : i32
    %c0_i32_1 = arith.constant 0 : i32
    return %c0_i32, %c0_i32_0 : i32, i32
  }
  func.func @transform_3(%arg0: i32) -> (i32, i32) {
    %c0_i32 = arith.constant 0 : i32
    %c0_i32_0 = arith.constant 0 : i32
    %c0_i32_1 = arith.constant 0 : i32
    return %c0_i32, %c0_i32_0 : i32, i32
  }
  func.func @transform_4(%arg0: i32) -> (i32, i32) {
    %c0_i32 = arith.constant 0 : i32
    %c0_i32_0 = arith.constant 0 : i32
    %c0_i32_1 = arith.constant 0 : i32
    return %c0_i32, %c0_i32_0 : i32, i32
  }
  func.func @transform_5(%arg0: i32) -> (i32, i32) {
    %c0_i32 = arith.constant 0 : i32
    %c0_i32_0 = arith.constant 0 : i32
    %c0_i32_1 = arith.constant 0 : i32
    return %c0_i32, %c0_i32_0 : i32, i32
  }
  func.func @transform_6(%arg0: i32) -> (i32, i32) {
    %c0_i32 = arith.constant 0 : i32
    %c0_i32_0 = arith.constant 0 : i32
    %c0_i32_1 = arith.constant 0 : i32
    return %c0_i32, %c0_i32_0 : i32, i32
  }
  func.func @transform_7(%arg0: i32) -> (i32, i32) {
    %c0_i32 = arith.constant 0 : i32
    %c0_i32_0 = arith.constant 0 : i32
    return %c0_i32, %arg0 : i32, i32
  }
}

</mosaic_0001>

<bundles_post_ra>
// kernel: tpu_custom_call.1
= control target key start
LH: loop header
LB: loop body
LE: loop exit
PB: predicated region body
PF: predicated region fallthrough
CT: control target
= control target key end

     0   :  { %v437_v2 = vmov 0   ;;  %s540_s0 = inlined_call_operand.vmem [shape: f32[3,128], index: 0, kind: input, shape index: {}]   ;;  %s541_s1 = inlined_call_operand.vmem [shape: f32[12,3], index: 1, kind: input, shape index: {}]   ;;  %s542_s2 = inlined_call_operand.vmem [shape: f32[12,1], index: 2, kind: input, shape index: {}]   ;;  %s543_s3 = inlined_call_operand.vmem [shape: f32[24,12], index: 3, kind: input, shape index: {}]   ;;  %s544_s4 = inlined_call_operand.vmem [shape: f32[24,1], index: 4, kind: input, shape index: {}]   ;;  %s545_s5 = inlined_call_operand.vmem [shape: f32[9,24], index: 5, kind: input, shape index: {}]   ;;  %s546_s6 = inlined_call_operand.vmem [shape: f32[9,1], index: 6, kind: input, shape index: {}]   ;;  %s547_s7 = inlined_call_operand.hbm [shape: f32[9,128], index: 7, kind: output, shape index: {}]  }
   0x1   :  { %v29_v0 = vld [vmem:[%s541_s1 + $0x8] sm:$0xf]  ;;  %v28_v1 = vld [vmem:[%s541_s1] sm:$0xff]  ;;  %403 = vset.pattern.permute.xlu1 %v437_v2  ;;  %401 = vset.pattern.permute.xlu0 %v437_v2 }
   0x2   :  { %37 = vperm.xlu0 %401, %v29_v0   ;;  %32 = vperm.xlu1 %403, %v28_v1  }
   0x3   :  { %12 = vsyncpa [#allocation3], 0  ;;  %v438_v3 = vmov 1   ;;  %v439_v4 = vmov 2   ;;  %v79_v5 = vld [vmem:[%s542_s2 + $0x8] sm:$0xf]  ;;  %v40_v13 = vlaneseq }
   0x4   :  { %v440_v6 = vmov 0.0   ;;  %v78_v7 = vld [vmem:[%s542_s2] sm:$0xff]  ;;  %vm441_vm0 = vmmov 0   ;;  %v98_v8 = vld [vmem:[%s544_s4 + $0x8] sm:$0xff]  ;;  %v99_v11 = vld [vmem:[%s544_s4 + $0x10] sm:$0xff]  ;;  %vm125_vm1 = vcmask 1043456  }
   0x5   :  { %371 = vmatprep.subr.mxu0 %v440_v6  ;;  %375 = vmatprep.mubr.msk.f32.mxu0 %vm441_vm0, %v440_v6  ;;  %v97_v9 = vld [vmem:[%s544_s4] sm:$0xff]  ;;  %v215_v12 = vld [vmem:[%s546_s6 + $0x8] sm:$0x1]  ;;  %v41_v14 = vshrl.u32 %v40_v13, 7  ;;  %vm115_vm2 = vcmask 97280   ;;  %v96_v46 = vld [vmem:[%s543_s3 + $0x10] sm:$0xff] }
   0x6   :  { %402 = vset.pattern.permute.xlu0 %v438_v3  ;;  %404 = vset.pattern.permute.xlu1 %v438_v3  ;;  %v214_v10 = vld [vmem:[%s546_s6] sm:$0xff]  ;;  %v95_v45 = vld [vmem:[%s543_s3 + $0x8] sm:$0xff]  ;;  %vm226_vm3 = vcmask 195584   ;;  %vm308_vm4 = vcmask 1040384  }
   0x7   :  { %51 = vperm.xlu0 %402, %v29_v0   ;;  %47 = vperm.xlu1 %404, %v28_v1   ;;  %v56_v15 = vsub.s32 1, %v41_v14  ;;  %v42_v18 = vsub.s32 0, %v41_v14  ;;  %v27_v19 = vld [vmem:[%s540_s0] sm:$0x7]  ;;  %v72_v21 = vsub.s32 2, %v41_v14 }
   0x8   :  { %v94_v44 = vld [vmem:[%s543_s3] sm:$0xff]  ;;  %v213_v63 = vld [vmem:[%s545_s5 + $0x8] sm:$0x1] }
   0x9   :  { %v57_v20 = vrot.slane %v27_v19, %v56_v15  ;;  %v43_v22 = vrot.slane %v27_v19, %v42_v18  ;;  %v73_v27 = vrot.slane %v27_v19, %v72_v21  ;;  %v212_v47 = vld [vmem:[%s545_s5] sm:$0xff]  ;;  %s442_s5 = smov [#allocation2]  }
   0xa   :  { %390 = vmatprep.mubr.msk.f32.mxu1 %vm226_vm3, %v212_v47  ;;  %s344_s25 = sshll.u32 %s442_s5, 4  ;;  %s345_s25 = int_to_ptr.vmem [resolvable:$true] %s344_s25 }
   0xb   :  { %406 = vset.pattern.permute.xlu0 %v439_v4  ;;  %405 = vset.pattern.permute.xlu1 %v439_v4  ;;  %s415_s26 = scalar_lea.vmem %s345_s25, 256  ;;  %p420_p1 = scmp.lt.s32.totalorder %s345_s25, %s345_s25 }
   0xc   :  { %63 = vperm.xlu0 %406, %v28_v1   ;;  %67 = vperm.xlu1 %405, %v29_v0   ;;  %p416_p0 = scmp.ne.s32.totalorder %s345_s25, %s415_s26  ;;  %p421_p2 = scmp.lt.s32.totalorder %s415_s26, %s415_s26 }
   0xe   :  { %p422_p3 = por %p421_p2, %p420_p1 }
  0x10   :  { %407 = vset.pattern.permute.xlu1 %v437_v2  ;;  %408 = vset.pattern.permute.xlu0 %v437_v2  ;;  %p423_p4 = pnand %p422_p3, %p416_p0 }
  0x11   :  { %87 = vperm.xlu1 %407, %v79_v5   ;;  %112 = vperm.xlu0 %408, %v99_v11  }
  0x15   :  { %82 = vperm.xlu1 %407, %v78_v7   ;;  %223 = vperm.xlu0 %408, %v215_v12  }
  0x19   :  { %107 = vperm.xlu1 %407, %v98_v8  }
  0x1d   :  { %102 = vperm.xlu1 %407, %v97_v9  }
  0x21   :  { %218 = vperm.xlu1 %407, %v214_v10  }
  0x7d   :  { %v33_v16 = vpop.permute.xlu1 %32  ;;  %v38_v17 = vpop.permute.xlu0 %37 }
  0x7e   :  { %v45_v25 = vmul.f32 %v43_v22, %v38_v17  ;;  %v44_v34 = vmul.f32 %v43_v22, %v33_v16 }
  0x82   :  { %v52_v23 = vpop.permute.xlu0 %51  ;;  %v48_v24 = vpop.permute.xlu1 %47 }
  0x83   :  { %v59_v26 = vmul.f32 %v57_v20, %v52_v23  ;;  %v58_v32 = vmul.f32 %v57_v20, %v48_v24 }
  0x85   :  { %v61_v29 = vadd.f32 %v59_v26, %v45_v25  ;;  %v60_v37 = vadd.f32 %v58_v32, %v44_v34 }
  0x87   :  { %v68_v28 = vpop.permute.xlu1 %67  ;;  %v64_v30 = vpop.permute.xlu0 %63 }
  0x88   :  { %v75_v31 = vmul.f32 %v73_v27, %v68_v28  ;;  %v74_v35 = vmul.f32 %v73_v27, %v64_v30 }
  0x8a   :  { %v77_v33 = vadd.f32 %v75_v31, %v61_v29  ;;  %v76_v40 = vadd.f32 %v74_v35, %v60_v37 }
  0x8c   :  { %v88_v36 = vpop.permute.xlu1 %87  ;;  %v113_v53 = vpop.permute.xlu0 %112 }
  0x8d   :  { %v91_v38 = vadd.f32 %v88_v36, %v77_v33 }
  0x8f   :  { %v93_v39 = vmax.f32 %v91_v38, 0.0 }
  0x90   :  { %v83_v41 = vpop.permute.xlu1 %82  ;;  %v224_v0 = vpop.permute.xlu0 %223 }
  0x91   :  { %v90_v42 = vadd.f32 %v83_v41, %v76_v40  ;;  %372 = vmatpush3.msk.msra.mxu0 %vm125_vm1, %v93_v39 }
  0x92   :  { %373 = vmatprep.subr.mxu0 %v440_v6 }
  0x93   :  { %v92_v43 = vmax.f32 %v90_v42, 0.0 }
  0x94   :  { %v108_v50 = vpop.permute.xlu1 %107 }
  0x95   :  { %374 = vmatpush3.msra.mxu0 %v92_v43 }
  0x96   :  { %376 = vmatmul.mubr.msk.f32.vlgmr.msra.gmra.mxu0 %vm115_vm2, %v94_v44 }
  0x97   :  { %378 = vmatprep.mubr.msk.f32.mxu0 %vm441_vm0, %v440_v6 }
  0x98   :  { %v103_v57 = vpop.permute.xlu1 %102 }
  0x9a   :  { %379 = vmatmul.mubr.msk.f32.gmra.mxu0 %vm115_vm2, %v95_v45 }
  0x9b   :  { %381 = vmatprep.mubr.msk.f32.mxu0 %vm441_vm0, %v440_v6 }
  0x9c   :  { %v219_v3 = vpop.permute.xlu1 %218 }
  0x9e   :  { %382 = vmatmul.mubr.msk.f32.gmra.mxu0 %vm115_vm2, %v96_v46 }
 0x156   :  { %v195_v48 = vpop.f32.mrf.mxu0 }
 0x157   :  { %v196_v59 = vadd.f32 %v195_v48, %v103_v57 }
 0x158   :  { %v377_v49 = vpop.f32.mrf.mxu0 }
 0x159   :  { %v209_v62 = vmax.f32 %v196_v59, 0.0 }
 0x15a   :  { %v200_v51 = vpop.f32.mrf.mxu0 }
 0x15b   :  { %v201_v55 = vadd.f32 %v200_v51, %v108_v50 }
 0x15c   :  { %v380_v52 = vpop.f32.mrf.mxu0 }
 0x15d   :  { %v210_v61 = vmax.f32 %v201_v55, 0.0 }
 0x15e   :  { %v205_v54 = vpop.f32.mrf.mxu0 }
 0x15f   :  { %v206_v56 = vadd.f32 %v205_v54, %v113_v53 }
 0x160   :  { %v383_v58 = vpop.f32.mrf.mxu0 }
 0x161   :  { %v211_v60 = vmax.f32 %v206_v56, 0.0 }
 0x163   :  { %384 = vmatprep.subr.mxu1 %v211_v60 }
 0x164   :  { %385 = vmatpush3.msra.mxu1 %v211_v60 }
 0x165   :  { %386 = vmatprep.subr.mxu1 %v210_v61 }
 0x166   :  { %387 = vmatpush3.msra.mxu1 %v210_v61 }
 0x167   :  { %388 = vmatprep.subr.mxu1 %v209_v62 }
 0x168   :  { %389 = vmatpush3.msra.mxu1 %v209_v62 }
 0x169   :  { %391 = vmatmul.mubr.msk.f32.vlgmr.msra.gmra.mxu1 %vm226_vm3, %v213_v63 }
 0x229   :  { %v392_v1 = vpop.f32.mrf.mxu1 }
 0x22a   :  { %v305_v2 = vadd.f32 %v392_v1, %v224_v0 }
 0x22b   :  { %v299_v4 = vpop.f32.mrf.mxu1 }
 0x22c   :  { %v309_v5 = vsel %vm308_vm4, %v305_v2, -inf  ;;  %v300_v6 = vadd.f32 %v299_v4, %v219_v3 }
 0x22e   :  { %v310_v7 = vmax.f32 %v300_v6, %v309_v5 }
 0x230   :  { %v311_v8 = vrot.slane %v310_v7, 4 }
 0x232   :  { %v312_v9 = vmax.f32 %v310_v7, %v311_v8 }
 0x234   :  { %v313_v10 = vrot.slane %v312_v9, 2 }
 0x236   :  { %v314_v11 = vmax.f32 %v312_v9, %v313_v10 }
 0x238   :  { %v315_v12 = vrot.slane %v314_v11, 1 }
 0x23a   :  { %v316_v13 = vmax.f32 %v314_v11, %v315_v12 }
 0x23c   :  { %v317_v14 = vsub.f32 %v300_v6, %v316_v13  ;;  %v318_v15 = vsub.f32 %v305_v2, %v316_v13 }
 0x23e   :  { %v319_v16 = vmul.f32 1.442695, %v317_v14  ;;  %v321_v17 = vmul.f32 1.442695, %v318_v15 }
 0x240   :  { %409 = vpow2.f32 %v319_v16 }
 0x241   :  { %411 = vpow2.f32 %v321_v17 }
 0x24d   :  { %v410_v18 = vpop.eup %409 }
 0x24e   :  { %v412_v19 = vpop.eup %411 }
 0x24f   :  { %v323_v20 = vsel %vm308_vm4, %v412_v19, 0.0 }
 0x250   :  { %v324_v21 = vadd.f32 %v410_v18, %v323_v20 }
 0x252   :  { %v325_v22 = vrot.slane %v324_v21, 4 }
 0x254   :  { %v326_v23 = vadd.f32 %v325_v22, %v324_v21 }
 0x256   :  { %v327_v24 = vrot.slane %v326_v23, 2 }
 0x258   :  { %v328_v25 = vadd.f32 %v327_v24, %v326_v23 }
 0x25a   :  { %v329_v26 = vrot.slane %v328_v25, 1 }
 0x25c   :  { %v330_v27 = vadd.f32 %v329_v26, %v328_v25 }
 0x25e   :  { %413 = vrcp.f32 %v330_v27 }
 0x26b   :  { %v414_v28 = vpop.eup %413 }
 0x26c   :  { %v332_v29 = vmul.f32 %v414_v28, %v330_v27 }
 0x26e   :  { %v333_v30 = vsub.f32 2.0, %v332_v29 }
 0x270   :  { %v334_v31 = vmul.f32 %v414_v28, %v333_v30 }
 0x272   :  { %v335_v32 = vmul.f32 %v410_v18, %v334_v31  ;;  %v336_v33 = vmul.f32 %v412_v19, %v334_v31 }
 0x274   :  { %337 = vst [vmem:[#allocation2] sm:$0xff] %v335_v32  ;;  %338 = vst [vmem:[#allocation2 + $0x8] sm:$0x1] %v336_v33 }
 0x275   :  { %426 = shalt.err (!%p423_p4)
}
 0x276   :  { %s443_s27 = smov 128   ;;  %s444_s28 = smov 8  }
 0x277   :  { %350 = dma.vmem_to_hbm [thread:$0]  %s345_s25, 256, %s547_s7, [#allocation3], %s443_s27, %s443_s27, %s444_s28  }
 0x278   :  { %435 = dma.done.wait [#allocation3], 256  }
 0x279   :  { %436 = vsyncadd [#allocation3], 4294967040 }
 0x27a   :  { %354 = vsyncpa [#allocation3], 1 }

</bundles_post_ra>
